<compile_context>
chip_gen: v6e
topology: v6e:2x2x1
jax: 0.10.0
libtpu: 0.0.40
codegen_flags: <defaults>
</compile_context>

<pallas_src>
import functools

import jax
import jax.numpy as jnp
from jax.experimental import pallas as pl
from jax.experimental.pallas import tpu as pltpu

_LANES = 128             # vreg lane width
_SUBLANES = 8            # f32 vreg sublane count
_COLS = 2 * _LANES       # one slab row = 128 samples (pos/neg interleaved)
_MAX_TILE_ROWS = 1024    # (1024, 256) f32 block = 1 MiB; x2 buffers = 2 MiB


def _round_up(x: int, m: int) -> int:
    return ((x + m - 1) // m) * m


def _fold_rows(v, tile_r):
    """(tile_r, 256) -> (8, 256): sum groups of 8 sublanes with a balanced tree
    of aligned static slices + VPU adds (no reshape, short dependency chains)."""
    if tile_r == _SUBLANES:
        return v
    chunks = [v[k * _SUBLANES:(k + 1) * _SUBLANES]
              for k in range(tile_r // _SUBLANES)]
    while len(chunks) > 1:
        nxt = [chunks[a] + chunks[a + 1] for a in range(0, len(chunks) - 1, 2)]
        if len(chunks) % 2:
            nxt.append(chunks[-1])
        chunks = nxt
    return chunks[0]


def _bpr_loss_kernel(x_ref, out_ref, acc_ref, *, true_b, tile_r, n_inner,
                     need_mask):
    """x_ref: (tile_r, 256) interleaved scores tile (even lane = pos, odd = neg)
    out_ref: (1, 1) SMEM per-split partial loss
    acc_ref: (8, 256) f32 accumulator (persists across the inner grid axis)."""
    j = pl.program_id(1)

    @pl.when(j == 0)
    def _init():
        acc_ref[...] = jnp.zeros_like(acc_ref)

    x = x_ref[...].astype(jnp.float32)                      # (tile_r, 256)
    # Lane rotate by -1 (== +255 on a 256-lane axis; XLU slot, otherwise idle)
    # so every even lane sees its paired negative score from one lane right.
    xn = pltpu.roll(x, shift=_COLS - 1, axis=1)
    d = x - xn                                              # even lanes: pos-neg

    # -log(sigmoid(d)) == softplus(-d) = max(-d, 0) + log(1 + exp(-|d|)).
    # Stable for any d; argument of log is in [1, 2] so log(1+x) precision is
    # plenty (log1p kept out to stay on the proven lowering path).
    loss_el = jnp.maximum(-d, 0.0) + jnp.log(1.0 + jnp.exp(-jnp.abs(d)))

    if need_mask:
        tile_idx = pl.program_id(0) * n_inner + j
        # Tile contains padded samples iff it reaches past the true batch.
        has_pad = (tile_idx + 1) * (tile_r * _LANES) > true_b

        @pl.when(jnp.logical_not(has_pad))
        def _acc_unmasked():
            acc_ref[...] += _fold_rows(loss_el, tile_r)

        @pl.when(has_pad)
        def _acc_masked():
            # Flat element index in the padded slab; valid elements are exactly
            # the first 2*B (layout is bit-identical to the padded (B,2) array).
            row = jax.lax.broadcasted_iota(jnp.int32, loss_el.shape, 0)
            lane = jax.lax.broadcasted_iota(jnp.int32, loss_el.shape, 1)
            elem = (tile_idx * tile_r + row) * _COLS + lane
            masked = jnp.where(elem < 2 * true_b, loss_el, 0.0)
            acc_ref[...] += _fold_rows(masked, tile_r)
    else:
        acc_ref[...] += _fold_rows(loss_el, tile_r)

    @pl.when(j == pl.num_programs(1) - 1)
    def _finalize():
        # Odd lanes hold roll junk; one parity select + one cross-lane (XLU)
        # reduce per split, then divide by the true batch size.
        lane = jax.lax.broadcasted_iota(jnp.int32, acc_ref.shape, 1)
        keep = (lane & 1) == 0
        out_ref[0, 0] = jnp.sum(
            jnp.where(keep, acc_ref[...], 0.0)) * (1.0 / true_b)


def bpr_pairwise_loss(scores: jax.Array) -> jax.Array:
    """scores: (batch_size, 2); column 0 positive, column 1 negative.
    Returns scalar float32 loss = -mean(log(sigmoid(pos - neg)))."""
    assert scores.ndim == 2 and scores.shape[1] == 2
    B = scores.shape[0]
    assert B >= 1

    # --- tiling: 128 samples per slab row, (8, 128)-aligned tiles -----------
    rows = pl.cdiv(B, _LANES)
    tile_r = min(_MAX_TILE_ROWS, _round_up(rows, _SUBLANES))
    n_tiles = pl.cdiv(rows, tile_r)
    n_split = 2 if n_tiles >= 2 else 1          # megacore split as soon as >1 tile
    n_inner = pl.cdiv(n_tiles, n_split)
    r_pad = n_split * n_inner * tile_r
    b_pad = r_pad * _LANES
    need_mask = b_pad != B

    x = scores
    if need_mask:
        # Ragged batch: zero-pad samples; the kernel masks them in the
        # boundary tile(s) only (gated by pl.when).
        x = jnp.pad(x, ((0, b_pad - B), (0, 0)))
    # Bit-identical reshape (no transpose, no extra HBM pass): even lanes hold
    # positive scores, odd lanes the matching negatives.
    x = x.reshape(r_pad, _COLS)

    kernel = functools.partial(
        _bpr_loss_kernel, true_b=B, tile_r=tile_r, n_inner=n_inner,
        need_mask=need_mask)

    itemsize = jnp.dtype(scores.dtype).itemsize
    cost = pl.CostEstimate(
        flops=10 * b_pad,
        transcendentals=2 * b_pad,
        bytes_accessed=2 * b_pad * itemsize + 4 * n_split,
    )

    partials = pl.pallas_call(
        kernel,
        out_shape=jax.ShapeDtypeStruct((n_split, 1), jnp.float32),
        grid_spec=pltpu.PrefetchScalarGridSpec(
            num_scalar_prefetch=0,
            grid=(n_split, n_inner),
            in_specs=[pl.BlockSpec(
                (tile_r, _COLS), lambda i, j: (i * n_inner + j, 0))],
            out_specs=pl.BlockSpec(
                (1, 1), lambda i, j: (i, 0), memory_space=pltpu.SMEM),
            scratch_shapes=[pltpu.VMEM((_SUBLANES, _COLS), jnp.float32)],
        ),
        compiler_params=pltpu.CompilerParams(
            dimension_semantics=("parallel", "arbitrary")),
        cost_estimate=cost,
    )(x)

    # Each per-split partial is already divided by the true B; just sum them.
    return jnp.sum(partials)


def _reference_loss(scores: jax.Array) -> jax.Array:
    diff = scores[:, 0].astype(jnp.float32) - scores[:, 1].astype(jnp.float32)
    return -jnp.mean(jnp.log(jax.nn.sigmoid(diff)))


if __name__ == "__main__":
    key = jax.random.PRNGKey(0)
    k1, k2, k3 = jax.random.split(key, 3)

    # Small batch (heavy-padding path): outputs.score is (batch_size, 2),
    # first column positive, second negative.
    scores = jax.random.normal(k1, (8, 2), dtype=jnp.float32)
    loss = bpr_pairwise_loss(scores)
    jax.block_until_ready(loss)
    ref = _reference_loss(scores)
    assert jnp.allclose(loss, ref, atol=1e-5, rtol=1e-5), (loss, ref)

    # Ragged batch: exercises the pl.when-gated boundary-tile masking.
    scores2 = 3.0 * jax.random.normal(k2, (1000, 2), dtype=jnp.float32)
    loss2 = bpr_pairwise_loss(scores2)
    jax.block_until_ready(loss2)
    ref2 = _reference_loss(scores2)
    assert jnp.allclose(loss2, ref2, atol=1e-5, rtol=1e-4), (loss2, ref2)

    # Aligned batch: no pad is materialized and no mask code is emitted.
    scores3 = jax.random.normal(k3, (2048, 2), dtype=jnp.float32)
    loss3 = bpr_pairwise_loss(scores3)
    jax.block_until_ready(loss3)
    ref3 = _reference_loss(scores3)
    assert jnp.allclose(loss3, ref3, atol=1e-5, rtol=1e-4), (loss3, ref3)

    print("KERNEL_OK")
</pallas_src>

<mosaic_0001>
module attributes {stable_mosaic.version = 11 : i64} {
  func.func @_bpr_loss_kernel(%arg0: i32, %arg1: i32, %arg2: memref<8x256xf32, #tpu.memory_space<vmem>>, %arg3: memref<1x1xf32, #tpu.memory_space<smem>>, %arg4: memref<8x256xf32, #tpu.memory_space<vmem>>) attributes {dimension_semantics = [#tpu.dimension_semantics<parallel>, #tpu.dimension_semantics<arbitrary>], iteration_bounds = array<i64: 1, 1>, scalar_prefetch = 0 : i64, scratch_operands = 1 : i64, tpu.core_type = #tpu.core_type<tc>, window_params = [{transform_indices = @transform_0, window_bounds = array<i64: 8, 256>}, {transform_indices = @transform_1, window_bounds = array<i64: 1, 1>}]} {
    %c0_i32 = arith.constant 0 : i32
    %0 = arith.cmpi eq, %arg1, %c0_i32 : i32
    %1 = arith.extui %0 : i1 to i32
    %c0_i32_0 = arith.constant 0 : i32
    %2 = arith.cmpi ne, %1, %c0_i32_0 : i32
    scf.if %2 {
      %cst_10 = arith.constant 0.000000e+00 : f32
      %31 = vector.broadcast %cst_10 : f32 to vector<8x256xf32>
      %c0_11 = arith.constant 0 : index
      %c0_12 = arith.constant 0 : index
      %32 = vector.load %arg4[%c0_11, %c0_12] : memref<8x256xf32, #tpu.memory_space<vmem>>, vector<8x256xf32>
      tpu.vector_store %arg4[%c0_11, %c0_12], %31 {strides = array<i32>} : memref<8x256xf32, #tpu.memory_space<vmem>>, vector<8x256xf32>,
    } else {
    }
    %c0 = arith.constant 0 : index
    %c0_1 = arith.constant 0 : index
    %3 = vector.load %arg2[%c0, %c0_1] : memref<8x256xf32, #tpu.memory_space<vmem>>, vector<8x256xf32>
    %c255_i32 = arith.constant 255 : i32
    %4 = tpu.dynamic_rotate %3 by %c255_i32 dim 1 : vector<8x256xf32>, i32 -> vector<8x256xf32>
    %5 = arith.subf %3, %4 : vector<8x256xf32>
    %cst = arith.constant 0.000000e+00 : f32
    %6 = vector.broadcast %cst : f32 to vector<8x256xf32>
    %7 = arith.subf %6, %5 : vector<8x256xf32>
    %cst_2 = arith.constant 0.000000e+00 : f32
    %8 = vector.broadcast %cst_2 : f32 to vector<8x256xf32>
    %9 = arith.maximumf %7, %8 : vector<8x256xf32>
    %10 = math.absf %5 : vector<8x256xf32>
    %cst_3 = arith.constant 0.000000e+00 : f32
    %11 = vector.broadcast %cst_3 : f32 to vector<8x256xf32>
    %12 = arith.subf %11, %10 : vector<8x256xf32>
    %13 = math.exp %12 : vector<8x256xf32>
    %cst_4 = arith.constant 1.000000e+00 : f32
    %14 = vector.broadcast %cst_4 : f32 to vector<8x256xf32>
    %15 = arith.addf %14, %13 : vector<8x256xf32>
    %16 = math.log %15 : vector<8x256xf32>
    %17 = arith.addf %9, %16 : vector<8x256xf32>
    %c1_i32 = arith.constant 1 : i32
    %18 = arith.muli %arg0, %c1_i32 : i32
    %19 = arith.addi %18, %arg1 : i32
    %c1_i32_5 = arith.constant 1 : i32
    %20 = arith.addi %19, %c1_i32_5 : i32
    %c1024_i32 = arith.constant 1024 : i32
    %21 = arith.muli %20, %c1024_i32 : i32
    %c8_i32 = arith.constant 8 : i32
    %22 = arith.cmpi sgt, %21, %c8_i32 : i32
    %true = arith.constant true
    %23 = arith.xori %22, %true : i1
    %24 = arith.extui %23 : i1 to i32
    %c0_i32_6 = arith.constant 0 : i32
    %25 = arith.cmpi ne, %24, %c0_i32_6 : i32
    scf.if %25 {
      %c0_10 = arith.constant 0 : index
      %c0_11 = arith.constant 0 : index
      %31 = vector.load %arg4[%c0_10, %c0_11] : memref<8x256xf32, #tpu.memory_space<vmem>>, vector<8x256xf32>
      %32 = arith.addf %31, %17 : vector<8x256xf32>
      %c0_12 = arith.constant 0 : index
      %c0_13 = arith.constant 0 : index
      %33 = vector.load %arg4[%c0_12, %c0_13] : memref<8x256xf32, #tpu.memory_space<vmem>>, vector<8x256xf32>
      tpu.vector_store %arg4[%c0_12, %c0_13], %32 {strides = array<i32>} : memref<8x256xf32, #tpu.memory_space<vmem>>, vector<8x256xf32>,
    } else {
    }
    %26 = arith.extui %22 : i1 to i32
    %c0_i32_7 = arith.constant 0 : i32
    %27 = arith.cmpi ne, %26, %c0_i32_7 : i32
    scf.if %27 {
      %31 = tpu.iota {dimensions = array<i32: 0>} : vector<8x256xi32>
      %32 = tpu.iota {dimensions = array<i32: 1>} : vector<8x256xi32>
      %c8_i32_10 = arith.constant 8 : i32
      %33 = arith.muli %19, %c8_i32_10 : i32
      %34 = vector.broadcast %33 : i32 to vector<8x256xi32>
      %35 = arith.addi %34, %31 : vector<8x256xi32>
      %c256_i32 = arith.constant 256 : i32
      %36 = vector.broadcast %c256_i32 : i32 to vector<8x256xi32>
      %37 = arith.muli %35, %36 : vector<8x256xi32>
      %38 = arith.addi %37, %32 : vector<8x256xi32>
      %c16_i32 = arith.constant 16 : i32
      %39 = vector.broadcast %c16_i32 : i32 to vector<8x256xi32>
      %40 = arith.cmpi slt, %38, %39 : vector<8x256xi32>
      %cst_11 = arith.constant 0.000000e+00 : f32
      %41 = vector.broadcast %cst_11 : f32 to vector<8x256xf32>
      %42 = arith.select %40, %17, %41 : vector<8x256xi1>, vector<8x256xf32>
      %c0_12 = arith.constant 0 : index
      %c0_13 = arith.constant 0 : index
      %43 = vector.load %arg4[%c0_12, %c0_13] : memref<8x256xf32, #tpu.memory_space<vmem>>, vector<8x256xf32>
      %44 = arith.addf %43, %42 : vector<8x256xf32>
      %c0_14 = arith.constant 0 : index
      %c0_15 = arith.constant 0 : index
      %45 = vector.load %arg4[%c0_14, %c0_15] : memref<8x256xf32, #tpu.memory_space<vmem>>, vector<8x256xf32>
      tpu.vector_store %arg4[%c0_14, %c0_15], %44 {strides = array<i32>} : memref<8x256xf32, #tpu.memory_space<vmem>>, vector<8x256xf32>,
    } else {
    }
    %c0_i32_8 = arith.constant 0 : i32
    %28 = arith.cmpi eq, %arg1, %c0_i32_8 : i32
    %29 = arith.extui %28 : i1 to i32
    %c0_i32_9 = arith.constant 0 : i32
    %30 = arith.cmpi ne, %29, %c0_i32_9 : i32
    scf.if %30 {
      %31 = tpu.iota {dimensions = array<i32: 1>} : vector<8x256xi32>
      %c1_i32_10 = arith.constant 1 : i32
      %32 = vector.broadcast %c1_i32_10 : i32 to vector<8x256xi32>
      %33 = arith.andi %31, %32 : vector<8x256xi32>
      %c0_i32_11 = arith.constant 0 : i32
      %34 = vector.broadcast %c0_i32_11 : i32 to vector<8x256xi32>
      %35 = arith.cmpi eq, %33, %34 : vector<8x256xi32>
      %c0_12 = arith.constant 0 : index
      %c0_13 = arith.constant 0 : index
      %36 = vector.load %arg4[%c0_12, %c0_13] : memref<8x256xf32, #tpu.memory_space<vmem>>, vector<8x256xf32>
      %cst_14 = arith.constant 0.000000e+00 : f32
      %37 = vector.broadcast %cst_14 : f32 to vector<8x256xf32>
      %38 = arith.select %35, %36, %37 : vector<8x256xi1>, vector<8x256xf32>
      %39 = vector.shape_cast %38 : vector<8x256xf32> to vector<1x8x256xf32>
      %cst_15 = arith.constant dense<0.000000e+00> : vector<1xf32>
      %40 = vector.multi_reduction <add>, %39, %cst_15 [1, 2] : vector<1x8x256xf32> to vector<1xf32>
      %41 = vector.shape_cast %40 : vector<1xf32> to vector<1x1x1xf32>
      %42 = vector.extract %41[0, 0, 0] : f32 from vector<1x1x1xf32>
      %cst_16 = arith.constant 1.250000e-01 : f32
      %43 = arith.mulf %42, %cst_16 : f32
      %c0_17 = arith.constant 0 : index
      %c0_18 = arith.constant 0 : index
      %44 = memref.load %arg3[%c0_17, %c0_18] : memref<1x1xf32, #tpu.memory_space<smem>>
      memref.store %43, %arg3[%c0_17, %c0_18] : memref<1x1xf32, #tpu.memory_space<smem>>
    } else {
    }
    return
  }
  func.func @transform_0(%arg0: i32, %arg1: i32) -> (i32, i32) {
    %c1_i32 = arith.constant 1 : i32
    %0 = arith.muli %arg0, %c1_i32 : i32
    %1 = arith.addi %0, %arg1 : i32
    %c0_i32 = arith.constant 0 : i32
    %c0_i32_0 = arith.constant 0 : i32
    return %1, %c0_i32 : i32, i32
  }
  func.func @transform_1(%arg0: i32, %arg1: i32) -> (i32, i32) {
    %c0_i32 = arith.constant 0 : i32
    %c0_i32_0 = arith.constant 0 : i32
    return %arg0, %c0_i32 : i32, i32
  }
}

</mosaic_0001>

<bundles_post_ra>
// kernel: tpu_custom_call.1
= control target key start
LH: loop header
LB: loop body
LE: loop exit
PB: predicated region body
PF: predicated region fallthrough
CT: control target
= control target key end

     0   :  { %6 = vsyncpa [#allocation4], 0  ;;  %s204_s0 = inlined_call_operand.hbm [shape: f32[8,256], index: 0, kind: input, shape index: {}]   ;;  %s205_s1 = inlined_call_operand.hbm [shape: f32[1,1], index: 1, kind: output, shape index: {}]  }
   0x1   :  { %7 = vsyncpa [#allocation5], 0  ;;  %s185_s6 = smov [#allocation3]  }
   0x2   :  { %s18_s7 = sshll.u32 %s185_s6, 4  ;;  %s19_s7 = int_to_ptr.vmem [resolvable:$true] %s18_s7 }
   0x3   :  { %s161_s8 = scalar_lea.vmem %s19_s7, 256  ;;  %p166_p1 = scmp.lt.s32.totalorder %s19_s7, %s19_s7 }
   0x4   :  { %p162_p0 = scmp.ne.s32.totalorder %s19_s7, %s161_s8  ;;  %p167_p2 = scmp.lt.s32.totalorder %s161_s8, %s161_s8 }
   0x6   :  { %p168_p3 = por %p167_p2, %p166_p1 }
   0x8   :  { %p169_p4 = pnand %p168_p3, %p162_p0 }
   0xa   :  { %172 = shalt.err (!%p169_p4)
}
   0xb   :  { %21 = dma.hbm_to_vmem [thread:$0]  %s204_s0, 256, %s19_s7, [#allocation4]  }
   0xc   :  { %181 = dma.done.wait [#allocation4], 256  }
   0xd   :  { %182 = vsyncadd [#allocation4], 4294967040  ;;  %v32_v0 = vld [vmem:[#allocation3] sm:$0xff]  ;;  %s186_s11 = smov 127   ;;  %v33_v1 = vld [vmem:[#allocation3 + $0x8] sm:$0xff]  ;;  %v38_v2 = vlaneseq  ;;  %s187_s13 = smov [#allocation6]  }
   0xe   :  { %34 = vrot.lane.b32.xlu0 %v32_v0, %s186_s11 }
   0xf   :  { %v39_v3 = vand.u32 127, %v38_v2  ;;  %v83_v20 = vshrl.u32 %v38_v2, 7 }
  0x11   :  { %vm40_vm0 = vcmp.lt.s32.totalorder %v39_v3, 127  ;;  %v88_v21 = vmul.u32 256, %v83_v20  ;;  %v84_v22 = vadd.s32 128, %v39_v3  ;;  %v105_v27 = vand.u32 1, %v39_v3 }
  0x12   :  { %36 = vrot.lane.b32.xlu0 %v33_v1, %s186_s11 }
  0x13   :  { %v89_v25 = vadd.s32 %v88_v21, %v39_v3  ;;  %v90_v26 = vadd.s32 %v88_v21, %v84_v22  ;;  %v106_v29 = vand.u32 1, %v84_v22  ;;  %vm107_vm3 = vcmp.eq.s32.totalorder %v105_v27, 0 }
  0x15   :  { %vm91_vm1 = vcmp.lt.s32.totalorder %v89_v25, 16  ;;  %vm92_vm2 = vcmp.lt.s32.totalorder %v90_v26, 16  ;;  %vm108_vm4 = vcmp.eq.s32.totalorder %v106_v29, 0 }
  0x80   :  { %v35_v4 = vpop.permute.xlu0 %34 }
  0x84   :  { %v37_v5 = vpop.permute.xlu0 %36 }
  0x85   :  { %v41_v6 = vsel %vm40_vm0, %v35_v4, %v37_v5  ;;  %v42_v7 = vsel %vm40_vm0, %v37_v5, %v35_v4 }
  0x86   :  { %v43_v8 = vsub.f32 %v32_v0, %v41_v6  ;;  %v44_v9 = vsub.f32 %v33_v1, %v42_v7 }
  0x88   :  { %v49_v10 = vand.u32 2147483647, %v43_v8  ;;  %v50_v11 = vand.u32 2147483647, %v44_v9  ;;  %v45_v23 = vsub.f32 0.0, %v43_v8  ;;  %v46_v24 = vsub.f32 0.0, %v44_v9 }
  0x8a   :  { %v51_v12 = vsub.f32 0.0, %v49_v10  ;;  %v52_v13 = vsub.f32 0.0, %v50_v11  ;;  %v47_v31 = vmax.f32 %v45_v23, 0.0  ;;  %v48_v33 = vmax.f32 %v46_v24, 0.0 }
  0x8c   :  { %v53_v14 = vmul.f32 1.442695, %v51_v12  ;;  %v55_v15 = vmul.f32 1.442695, %v52_v13 }
  0x8e   :  { %145 = vpow2.f32 %v53_v14 }
  0x8f   :  { %147 = vpow2.f32 %v55_v15 }
  0x9b   :  { %v146_v16 = vpop.eup %145 }
  0x9c   :  { %v148_v17 = vpop.eup %147  ;;  %v57_v18 = vadd.f32 1.0, %v146_v16 }
  0x9d   :  { %v58_v19 = vadd.f32 1.0, %v148_v17 }
  0x9e   :  { %149 = vlog2.f32 %v57_v18 }
  0x9f   :  { %151 = vlog2.f32 %v58_v19 }
  0xab   :  { %v150_v28 = vpop.eup %149 }
  0xac   :  { %v152_v30 = vpop.eup %151  ;;  %v60_v32 = vmul.f32 0.6931472, %v150_v28 }
  0xad   :  { %v62_v34 = vmul.f32 0.6931472, %v152_v30 }
  0xae   :  { %v63_v35 = vadd.f32 %v60_v32, %v47_v31 }
  0xaf   :  { %v64_v36 = vadd.f32 %v62_v34, %v48_v33 }
  0xb0   :  { %v93_v37 = vsel %vm91_vm1, %v63_v35, 0.0 }
  0xb1   :  { %v94_v38 = vsel %vm92_vm2, %v64_v36, 0.0  ;;  %v111_v39 = vsel %vm107_vm3, %v93_v37, 0.0 }
  0xb2   :  { %v112_v40 = vsel %vm108_vm4, %v94_v38, 0.0 }
  0xb3   :  { %v113_v41 = vadd.f32 %v112_v40, %v111_v39 }
  0xb5   :  { %114 = vadd.xlane.f32.xlu1 %v113_v41 }
 0x13e   :  { %v115_v42 = vpop.xlane.xlu1 %114 }
 0x13f   :  { %v116_v43 = vrot.slane %v115_v42, 4 }
 0x141   :  { %v117_v44 = vadd.f32 %v116_v43, %v115_v42 }
 0x143   :  { %v118_v45 = vrot.slane %v117_v44, 2 }
 0x145   :  { %v119_v46 = vadd.f32 %v118_v45, %v117_v44 }
 0x147   :  { %v120_v47 = vrot.slane %v119_v46, 1 }
 0x149   :  { %v121_v48 = vadd.f32 %v120_v47, %v119_v46 }
 0x14b   :  { %140 = vpush %v121_v48 }
 0x17c   :  { %s141_s0 = spop %140 }
 0x17d   :  { %s123_s12 = smul.f32 0.125, %s141_s0 }
 0x17f   :  { %125 = sst [smem:[#allocation6]] %s123_s12 }
 0x180   :  { %133 = dma.smem_to_hbm %s187_s13, 16, %s205_s1, [#allocation5]  }
 0x181   :  { %183 = dma.done.wait [#allocation5], 16  }
 0x182   :  { %184 = vsyncadd [#allocation5], 4294967280 }
 0x183   :  { %137 = sfence }
 0x184   :  { %138 = vsyncpa [#allocation4], 1 }
 0x185   :  { %139 = vsyncpa [#allocation5], 1 }

</bundles_post_ra>
